<compile_context>
chip_gen: v5e
topology: v5e:2x2
jax: 0.10.0
libtpu: 0.0.40
codegen_flags: <defaults>
</compile_context>

<pallas_src>
import jax
import jax.numpy as jnp
from jax import lax
from jax.experimental import pallas as pl
from jax.experimental.pallas import tpu as pltpu

_EPS = 1e-12
_EPS2 = _EPS * _EPS  # clamp on sum-of-squares: sqrt(max(ss, eps^2)) == max(||x||, eps)


def _sega_head_kernel(scale_ref, q_ref, s_ref, lab_ref, sel_ref, wbt_ref, out_ref):
    bt_block = q_ref.shape[0]

    scale = scale_ref[0]                     # scalar from SMEM (read once per step)
    wbt = wbt_ref[...]                       # (d, nKall) pre-normalized base weights

    for bt in range(bt_block):               # small static block of batch tasks
        # ---- query: row-wise L2 normalize; fold scale_cls into the rsqrt ----
        q = q_ref[bt]                                                  # (nq, d)
        q = q * (scale * lax.rsqrt(
            jnp.maximum(jnp.sum(q * q, axis=-1, keepdims=True), _EPS2)))

        # ---- base logits: all-class cosine scores, then padded one-hot column
        #      select -> lands directly in output columns [0, nKbase) ----
        s_all = lax.dot_general(q, wbt, (((1,), (0,)), ((), ())),
                                preferred_element_type=jnp.float32)    # (nq, nKall)
        base_pad = lax.dot_general(s_all, sel_ref[bt], (((1,), (0,)), ((), ())),
                                   preferred_element_type=jnp.float32)  # (nq, nK_pad)

        # ---- novel prototypes (FeatExemplarAvgBlock), already shifted/padded ----
        s = s_ref[bt]                                                  # (ns, d)
        s = s * lax.rsqrt(
            jnp.maximum(jnp.sum(s * s, axis=-1, keepdims=True), _EPS2))
        # 1/count folded into lab; lab columns occupy [nKbase, nK) of nK_pad, so
        # proto_t has zeros everywhere else (0 * rsqrt(eps^2) stays exactly 0).
        proto_t = lax.dot_general(s, lab_ref[bt], (((0,), (0,)), ((), ())),
                                  preferred_element_type=jnp.float32)  # (d, nK_pad)
        proto_t = proto_t * lax.rsqrt(
            jnp.maximum(jnp.sum(proto_t * proto_t, axis=0, keepdims=True), _EPS2))
        novel_pad = lax.dot_general(q, proto_t, (((1,), (0,)), ((), ())),
                                    preferred_element_type=jnp.float32)  # (nq, nK_pad)

        # ---- single lane-dense (128-multiple) store: disjoint columns, just add ----
        out_ref[bt] = base_pad + novel_pad


def sega_head_forward(query, support, support_labels, Kall, nKbase, n_way,
                      weight_base, scale_cls, batch_block=None):
    """Pallas implementation of SEGAhead.forward (weight_generator_type='none')."""
    B, n_query, d = query.shape
    n_support = support.shape[1]
    nKall = weight_base.shape[0]
    nK = nKbase + n_way
    nK_pad = 128 * pl.cdiv(nK, 128)          # lane-dense output, sliced back below

    if batch_block is None:
        # Fatter steps amortize the ~0.35us/step pipeline overhead; keep >=2 grid
        # steps so both v7x TensorCores see work (v5e/v6e have a single TC).
        batch_block = B // 2 if (B >= 2 and B % 2 == 0) else 1
    assert B % batch_block == 0

    # ---- batch-invariant prep, hoisted out of the kernel ----
    # L2-normalize base weights once (per-row => identical to normalizing the
    # gathered copies), keep them in (d, nKall) layout for a transpose-free MXU rhs.
    wb_inv = lax.rsqrt(jnp.maximum(
        jnp.sum(weight_base * weight_base, axis=-1, keepdims=True), _EPS2))
    wbt = (weight_base * wb_inv).T.astype(jnp.float32)                  # (d, nKall)

    # One-hot support labels with 1/count folded in -> class averaging is a matmul.
    # Padded so the novel columns land at [nKbase, nK) of the lane-dense output.
    lab = jax.nn.one_hot(support_labels - nKbase, n_way, dtype=jnp.float32)
    counts = jnp.sum(lab, axis=1, keepdims=True)                        # (B, 1, n_way)
    lab = lab / counts   # NaN for an empty novel class, matching the reference
    lab_pad = jnp.pad(lab, ((0, 0), (0, 0), (nKbase, nK_pad - nK)))     # (B, ns, nK_pad)

    # One-hot column selector replacing the materialized weight_base[Kbase_ids]
    # gather: sel[b, n, k] == 1 iff Kall[b, k] == n.  Padded to nK_pad columns so
    # the base logits land directly in output columns [0, nKbase).
    sel = jnp.swapaxes(
        jax.nn.one_hot(Kall[:, :nKbase], nKall, dtype=jnp.float32), 1, 2)  # (B, nKall, nKbase)
    sel_pad = jnp.pad(sel, ((0, 0), (0, 0), (0, nK_pad - nKbase)))         # (B, nKall, nK_pad)

    out = pl.pallas_call(
        _sega_head_kernel,
        out_shape=jax.ShapeDtypeStruct((B, n_query, nK_pad), jnp.float32),
        grid=(B // batch_block,),
        in_specs=[
            pl.BlockSpec(memory_space=pltpu.MemorySpace.SMEM),                    # scale_cls
            pl.BlockSpec((batch_block, n_query, d), lambda b: (b, 0, 0)),         # query
            pl.BlockSpec((batch_block, n_support, d), lambda b: (b, 0, 0)),       # support
            pl.BlockSpec((batch_block, n_support, nK_pad), lambda b: (b, 0, 0)),  # scaled one-hot (padded)
            pl.BlockSpec((batch_block, nKall, nK_pad), lambda b: (b, 0, 0)),      # base selector (padded)
            pl.BlockSpec((d, nKall), lambda b: (0, 0)),                           # base W (VMEM-resident)
        ],
        out_specs=pl.BlockSpec((batch_block, n_query, nK_pad), lambda b: (b, 0, 0)),
        compiler_params=pltpu.CompilerParams(dimension_semantics=("parallel",)),
        # NOTE: at realistic shapes (d>=512, nKall large) re-derive VMEM use against
        # v7x's 64 MiB and set vmem_limit_bytes explicitly if batch_block grows.
    )(scale_cls, query, support, lab_pad, sel_pad, wbt)

    return out[..., :nK]                      # drop lane padding


def sega_head_reference(query, support, support_labels, Kall, nKbase, n_way,
                        weight_base, scale_cls):
    """Pure-JAX reference mirroring the PyTorch forward pass."""
    lab = jax.nn.one_hot(support_labels - nKbase, n_way, dtype=jnp.float32)
    wb = weight_base[Kall[:, :nKbase]]
    s = support / jnp.maximum(
        jnp.linalg.norm(support, axis=-1, keepdims=True), _EPS)
    proto = jnp.einsum('bsk,bsd->bkd', lab, s) / jnp.sum(lab, axis=1)[..., None]
    cls_w = jnp.concatenate([wb, proto], axis=1)
    cls_w = cls_w / jnp.maximum(
        jnp.linalg.norm(cls_w, axis=-1, keepdims=True), _EPS)
    q = query / jnp.maximum(
        jnp.linalg.norm(query, axis=-1, keepdims=True), _EPS)
    return scale_cls[0] * jnp.einsum('bqd,bkd->bqk', q, cls_w)


if __name__ == "__main__":
    # Small shapes consistent with the module's forward:
    B, n_query, nFeat = 2, 8, 32
    n_way, n_shot = 5, 1
    n_support = n_way * n_shot
    nKall, nKbase = 64, 10

    key = jax.random.PRNGKey(0)
    k1, k2, k3 = jax.random.split(key, 3)

    # Deterministic parameter init (matches __init__: normal(0, sqrt(2/nFeat)), scale_cls=10)
    weight_base = (jax.random.normal(k1, (nKall, nFeat), jnp.float32)
                   * jnp.sqrt(2.0 / nFeat))
    scale_cls = jnp.array([10.0], jnp.float32)

    query = jax.random.normal(k2, (B, n_query, nFeat), jnp.float32)
    support = jax.random.normal(k3, (B, n_support, nFeat), jnp.float32)
    # support labels live in [nKbase, nKbase + n_way)
    support_labels = nKbase + jnp.tile(jnp.arange(n_way, dtype=jnp.int32), (B, 1))
    # Kall: first nKbase entries are base class ids, last n_way are novel ids
    Kall = jnp.stack([jnp.arange(nKbase + n_way, dtype=jnp.int32),
                      jnp.arange(20, 20 + nKbase + n_way, dtype=jnp.int32)], axis=0)

    logits = sega_head_forward(query, support, support_labels, Kall, nKbase,
                               n_way, weight_base, scale_cls)
    jax.block_until_ready(logits)

    ref = sega_head_reference(query, support, support_labels, Kall, nKbase,
                              n_way, weight_base, scale_cls)
    assert logits.shape == (B, n_query, nKbase + n_way)
    # rsqrt-based normalization vs sqrt+divide in the reference; logits are O(scale)=O(10).
    assert jnp.allclose(logits, ref, atol=1e-3, rtol=1e-3)

    # TODO(synk): other weight_generator_type branches ('feature_averaging',
    # 'transfer_base_weight', 'semantic_guided_attention_on_final_visproto') and the
    # support=None / nKbase=0 degenerate paths depend on LinearDiag / TransferBasedBlock /
    # SenmanticBlock whose code is not provided; only the 'none' branch is implemented.
    print("KERNEL_OK")
</pallas_src>

<mosaic_0001>
module attributes {stable_mosaic.version = 11 : i64} {
  func.func @_sega_head_kernel(%arg0: i32, %arg1: memref<1xf32, #tpu.memory_space<smem>>, %arg2: memref<1x8x32xf32, #tpu.memory_space<vmem>>, %arg3: memref<1x5x32xf32, #tpu.memory_space<vmem>>, %arg4: memref<1x5x128xf32, #tpu.memory_space<vmem>>, %arg5: memref<1x64x128xf32, #tpu.memory_space<vmem>>, %arg6: memref<32x64xf32, #tpu.memory_space<vmem>>, %arg7: memref<1x8x128xf32, #tpu.memory_space<vmem>>) attributes {dimension_semantics = [#tpu.dimension_semantics<parallel>], iteration_bounds = array<i64: 2>, scalar_prefetch = 0 : i64, scratch_operands = 0 : i64, tpu.core_type = #tpu.core_type<tc>, window_params = [{transform_indices = @transform_0, window_bounds = array<i64: 1>}, {transform_indices = @transform_1, window_bounds = array<i64: 1, 8, 32>}, {transform_indices = @transform_2, window_bounds = array<i64: 1, 5, 32>}, {transform_indices = @transform_3, window_bounds = array<i64: 1, 5, 128>}, {transform_indices = @transform_4, window_bounds = array<i64: 1, 64, 128>}, {pipeline_mode = #tpu.pipeline_mode<synchronous>, transform_indices = @transform_5, window_bounds = array<i64: 32, 64>}, {transform_indices = @transform_6, window_bounds = array<i64: 1, 8, 128>}]} {
    %c0 = arith.constant 0 : index
    %0 = memref.load %arg1[%c0] : memref<1xf32, #tpu.memory_space<smem>>
    %c0_0 = arith.constant 0 : index
    %c0_1 = arith.constant 0 : index
    %1 = vector.load %arg6[%c0_0, %c0_1] : memref<32x64xf32, #tpu.memory_space<vmem>>, vector<32x64xf32>
    %c0_2 = arith.constant 0 : index
    %c0_3 = arith.constant 0 : index
    %c0_4 = arith.constant 0 : index
    %2 = vector.load %arg2[%c0_2, %c0_3, %c0_4] : memref<1x8x32xf32, #tpu.memory_space<vmem>>, vector<1x8x32xf32>
    %3 = vector.shape_cast %2 : vector<1x8x32xf32> to vector<8x32xf32>
    %4 = arith.mulf %3, %3 : vector<8x32xf32>
    %cst = arith.constant dense<0.000000e+00> : vector<8xf32>
    %5 = vector.multi_reduction <add>, %4, %cst [1] : vector<8x32xf32> to vector<8xf32>
    %6 = vector.shape_cast %5 : vector<8xf32> to vector<8x1xf32>
    %cst_5 = arith.constant 1.000000e-24 : f32
    %7 = vector.broadcast %cst_5 : f32 to vector<8x1xf32>
    %8 = arith.maximumf %6, %7 : vector<8x1xf32>
    %9 = math.rsqrt %8 : vector<8x1xf32>
    %10 = vector.broadcast %0 : f32 to vector<8x1xf32>
    %11 = arith.mulf %10, %9 : vector<8x1xf32>
    %12 = vector.broadcast %11 : vector<8x1xf32> to vector<8x32xf32>
    %13 = arith.mulf %3, %12 : vector<8x32xf32>
    %cst_6 = arith.constant dense<0.000000e+00> : vector<8x64xf32>
    %14 = tpu.matmul %13, %1, %cst_6 {dimension_numbers = #tpu.dot_dimension_numbers<[1], [0], [0], [1], [0, 0, 1, 1], [], []>} : vector<8x32xf32>, vector<32x64xf32>, vector<8x64xf32> -> vector<8x64xf32>
    %c0_7 = arith.constant 0 : index
    %c0_8 = arith.constant 0 : index
    %c0_9 = arith.constant 0 : index
    %15 = vector.load %arg5[%c0_7, %c0_8, %c0_9] : memref<1x64x128xf32, #tpu.memory_space<vmem>>, vector<1x64x128xf32>
    %16 = vector.shape_cast %15 : vector<1x64x128xf32> to vector<64x128xf32>
    %cst_10 = arith.constant dense<0.000000e+00> : vector<8x128xf32>
    %17 = tpu.matmul %14, %16, %cst_10 {dimension_numbers = #tpu.dot_dimension_numbers<[1], [0], [0], [1], [0, 0, 1, 1], [], []>} : vector<8x64xf32>, vector<64x128xf32>, vector<8x128xf32> -> vector<8x128xf32>
    %c0_11 = arith.constant 0 : index
    %c0_12 = arith.constant 0 : index
    %c0_13 = arith.constant 0 : index
    %18 = vector.load %arg3[%c0_11, %c0_12, %c0_13] : memref<1x5x32xf32, #tpu.memory_space<vmem>>, vector<1x5x32xf32>
    %19 = vector.shape_cast %18 : vector<1x5x32xf32> to vector<5x32xf32>
    %20 = arith.mulf %19, %19 : vector<5x32xf32>
    %cst_14 = arith.constant dense<0.000000e+00> : vector<5xf32>
    %21 = vector.multi_reduction <add>, %20, %cst_14 [1] : vector<5x32xf32> to vector<5xf32>
    %22 = vector.shape_cast %21 : vector<5xf32> to vector<5x1xf32>
    %cst_15 = arith.constant 1.000000e-24 : f32
    %23 = vector.broadcast %cst_15 : f32 to vector<5x1xf32>
    %24 = arith.maximumf %22, %23 : vector<5x1xf32>
    %25 = math.rsqrt %24 : vector<5x1xf32>
    %26 = vector.broadcast %25 : vector<5x1xf32> to vector<5x32xf32>
    %27 = arith.mulf %19, %26 : vector<5x32xf32>
    %c0_16 = arith.constant 0 : index
    %c0_17 = arith.constant 0 : index
    %c0_18 = arith.constant 0 : index
    %28 = vector.load %arg4[%c0_16, %c0_17, %c0_18] : memref<1x5x128xf32, #tpu.memory_space<vmem>>, vector<1x5x128xf32>
    %29 = vector.shape_cast %28 : vector<1x5x128xf32> to vector<5x128xf32>
    %cst_19 = arith.constant dense<0.000000e+00> : vector<32x128xf32>
    %30 = tpu.matmul %27, %29, %cst_19 {dimension_numbers = #tpu.dot_dimension_numbers<[0], [0], [1], [1], [0, 1, 1, 1], [], []>} : vector<5x32xf32>, vector<5x128xf32>, vector<32x128xf32> -> vector<32x128xf32>
    %31 = arith.mulf %30, %30 : vector<32x128xf32>
    %cst_20 = arith.constant dense<0.000000e+00> : vector<128xf32>
    %32 = vector.multi_reduction <add>, %31, %cst_20 [0] : vector<32x128xf32> to vector<128xf32>
    %33 = vector.shape_cast %32 : vector<128xf32> to vector<1x128xf32>
    %cst_21 = arith.constant 1.000000e-24 : f32
    %34 = vector.broadcast %cst_21 : f32 to vector<1x128xf32>
    %35 = arith.maximumf %33, %34 : vector<1x128xf32>
    %36 = math.rsqrt %35 : vector<1x128xf32>
    %37 = vector.broadcast %36 : vector<1x128xf32> to vector<32x128xf32>
    %38 = arith.mulf %30, %37 : vector<32x128xf32>
    %cst_22 = arith.constant dense<0.000000e+00> : vector<8x128xf32>
    %39 = tpu.matmul %13, %38, %cst_22 {dimension_numbers = #tpu.dot_dimension_numbers<[1], [0], [0], [1], [0, 0, 1, 1], [], []>} : vector<8x32xf32>, vector<32x128xf32>, vector<8x128xf32> -> vector<8x128xf32>
    %40 = arith.addf %17, %39 : vector<8x128xf32>
    %c0_23 = arith.constant 0 : index
    %c0_24 = arith.constant 0 : index
    %c0_25 = arith.constant 0 : index
    %41 = vector.load %arg7[%c0_23, %c0_24, %c0_25] : memref<1x8x128xf32, #tpu.memory_space<vmem>>, vector<1x8x128xf32>
    %42 = vector.shape_cast %41 : vector<1x8x128xf32> to vector<8x128xf32>
    %43 = vector.shape_cast %40 : vector<8x128xf32> to vector<1x8x128xf32>
    tpu.vector_store %arg7[%c0_23, %c0_24, %c0_25], %43 {strides = array<i32>} : memref<1x8x128xf32, #tpu.memory_space<vmem>>, vector<1x8x128xf32>,
    return
  }
  func.func @transform_0(%arg0: i32) -> i32 {
    %c0_i32 = arith.constant 0 : i32
    %c0_i32_0 = arith.constant 0 : i32
    return %c0_i32 : i32
  }
  func.func @transform_1(%arg0: i32) -> (i32, i32, i32) {
    %c0_i32 = arith.constant 0 : i32
    %c0_i32_0 = arith.constant 0 : i32
    %c0_i32_1 = arith.constant 0 : i32
    return %arg0, %c0_i32, %c0_i32_0 : i32, i32, i32
  }
  func.func @transform_2(%arg0: i32) -> (i32, i32, i32) {
    %c0_i32 = arith.constant 0 : i32
    %c0_i32_0 = arith.constant 0 : i32
    %c0_i32_1 = arith.constant 0 : i32
    return %arg0, %c0_i32, %c0_i32_0 : i32, i32, i32
  }
  func.func @transform_3(%arg0: i32) -> (i32, i32, i32) {
    %c0_i32 = arith.constant 0 : i32
    %c0_i32_0 = arith.constant 0 : i32
    %c0_i32_1 = arith.constant 0 : i32
    return %arg0, %c0_i32, %c0_i32_0 : i32, i32, i32
  }
  func.func @transform_4(%arg0: i32) -> (i32, i32, i32) {
    %c0_i32 = arith.constant 0 : i32
    %c0_i32_0 = arith.constant 0 : i32
    %c0_i32_1 = arith.constant 0 : i32
    return %arg0, %c0_i32, %c0_i32_0 : i32, i32, i32
  }
  func.func @transform_5(%arg0: i32) -> (i32, i32) {
    %c0_i32 = arith.constant 0 : i32
    %c0_i32_0 = arith.constant 0 : i32
    %c0_i32_1 = arith.constant 0 : i32
    return %c0_i32, %c0_i32_0 : i32, i32
  }
  func.func @transform_6(%arg0: i32) -> (i32, i32, i32) {
    %c0_i32 = arith.constant 0 : i32
    %c0_i32_0 = arith.constant 0 : i32
    %c0_i32_1 = arith.constant 0 : i32
    return %arg0, %c0_i32, %c0_i32_0 : i32, i32, i32
  }
}

</mosaic_0001>

<bundles_post_ra>
// kernel: tpu_custom_call.1
= control target key start
LH: loop header
LB: loop body
LE: loop exit
PB: predicated region body
PF: predicated region fallthrough
CT: control target
= control target key end

     0   :  { %s1176_s0 = inlined_call_operand.<no memory space> [shape: f32[1], index: 0, kind: input, shape index: {}]   ;;  %s1177_s1 = inlined_call_operand.hbm [shape: f32[2,8,32], index: 1, kind: input, shape index: {}]   ;;  %s1178_s2 = inlined_call_operand.vmem [shape: f32[2,5,32], index: 2, kind: input, shape index: {}]   ;;  %s1179_s3 = inlined_call_operand.vmem [shape: f32[2,5,128], index: 3, kind: input, shape index: {}]   ;;  %s1180_s4 = inlined_call_operand.hbm [shape: f32[2,64,128], index: 4, kind: input, shape index: {}]   ;;  %s1181_s5 = inlined_call_operand.vmem [shape: f32[32,64], index: 5, kind: input, shape index: {}]   ;;  %s1182_s6 = inlined_call_operand.hbm [shape: f32[2,8,128], index: 6, kind: output, shape index: {}]  }
   0x1   :  { %1183 = sst [smem:[#allocation13_spill]] %s1177_s1 }
   0x2   :  { %11 = sst [smem:[#allocation2]] %s1176_s0 }
   0x3   :  { %12 = vsyncpa [#allocation4], 0 }
   0x4   :  { %14 = vsyncpa [#allocation4 + $0x1], 0 }
   0x5   :  { %15 = vsyncpa [#allocation7], 0 }
   0x6   :  { %17 = vsyncpa [#allocation7 + $0x1], 0 }
   0x7   :  { %18 = vsyncpa [#allocation5], 0 }
   0x8   :  { %20 = vsyncpa [#allocation5 + $0x1], 0  ;;  %s965_s23 = smov 0   ;;  %s967_s24 = smov 0  }
   0x9   :  { %s969_s25 = smov 0   ;;  %s971_s26 = smov 0  }
   0xa LB: > { %s986_s0 = sadd.s32 4294967295, %s923_s26   ;;  %s705_s27 = sadd.s32 4294967294, %s923_s26   ;;  %s923_s26 = sphi %s971_s26, %s1197_s26   ;;  %s919_s25 = sphi %s969_s25, %s1196_s25   ;;  %s915_s24 = sphi %s967_s24, %s1195_s24   ;;  %s911_s23 = sphi %s965_s23, %s1194_s23  }
   0xb   : > { %s990_s28 = sadd.s32 1, %s923_s26   ;;  %s54_s29 = sadd.s32 1, %s919_s25 }
   0xc   : > { %s51_s30 = ssub.s32 %s923_s26, %s990_s28  ;;  %p61_p0 = scmp.ne.s32.totalorder %s919_s25, %s915_s24 }
   0xd   : > { %p52_p1 = scmp.eq.s32.totalorder %s51_s30, 0  ;;  %p62_p2 = scmp.eq.s32.totalorder %s923_s26, 0 }
   0xe   : > { %p67_p3 = scmp.ne.s32.totalorder %s915_s24, %s911_s23  ;;  %p68_p4 = scmp.eq.s32.totalorder %s986_s0, 0 }
   0xf   : > { %s1002_s7 = scalar_select %p52_p1, %s919_s25, %s54_s29  }
  0x10   : > { %p1004_p5 = por %p62_p2, %p61_p0  ;;  %p1008_p6 = por %p68_p4, %p67_p3 }
  0x11   : > { %1184 = sst [smem:[#allocation12_spill]] %s1002_s7  ;;  %p190_p7 = scmp.eq.s32.totalorder %s986_s0, 1 }
  0x12   : > { %p196_p8 = scmp.eq.s32.totalorder %s705_s27, 1  ;;  %p750_p10 = scmp.lt.s32.totalorder %s923_s26, 2 }
  0x13   : > { %p1015_p11 = por %p190_p7, %p61_p0  ;;  %s1024_s12 = sand.u32 1, %s919_s25  }
  0x14   : > { %p1019_p12 = por %p196_p8, %p67_p3  ;;  %s709_s13 = sshll.u32 %s923_s26, 3 }
  0x15   : > { %s708_s14 = sshll.u32 %s1024_s12, 3  ;;  %s1189_s1 = sld [smem:[#allocation13_spill]] }
  0x16   : > { %s226_s19 = scalar_lea.vmem [#allocation3], %s708_s14  ;;  %p1033_p13 = pnand %p750_p10, %p1004_p5 }
  0x17   : > { %s234_s20 = sshll.u32 %s226_s19, 4  ;;  %p713_p0 = scmp.ge.s32.totalorder %s923_s26, 1  ;;  %s235_s20 = int_to_ptr.vmem [resolvable:$true] %s234_s20 }
  0x18   : > { %p275_p1 = scmp.lt.s32.totalorder %s923_s26, 3  ;;  %s710_s22 = sshll.u32 %s1024_s12, 6 }
  0x19   : > { %s223_s27 = scalar_lea.sflag [#allocation4], %s1024_s12  ;;  %p797_p3 = pneg %p1033_p13 }
  0x1b   : > { %s230_s17 = scalar_lea.hbm %s1189_s1, %s709_s13  ;;  %s800_s14 = scalar_lea.hbm %s1189_s1, 16 }
  0x1c   : > { %s232_s18 = sshll.u32 %s230_s17, 4  ;;  %s233_s18 = int_to_ptr.hbm [resolvable:$true] %s232_s18 }
  0x1d   : > { %s793_s29 = sshra.s32 %s233_s18, 4  ;;  %s794_s29 = int_to_ptr.hbm [resolvable:$true] %s793_s29 }
  0x1e   : > { %s795_s30 = scalar_lea.hbm %s794_s29, 8  ;;  %p801_p5 = scmp.lt.s32.totalorder %s794_s29, %s1189_s1 }
  0x1f   : > { %p796_p2 = scmp.ne.s32.totalorder %s794_s29, %s795_s30  ;;  %p802_p8 = scmp.lt.s32.totalorder %s800_s14, %s795_s30 }
  0x21   : > { %p798_p4 = pnand %p797_p3, %p796_p2  ;;  %p803_p10 = por %p802_p8, %p801_p5 }
  0x23   : > { %p799_p7 = pneg %p798_p4 }
  0x25   : > { %p804_p9 = pnand %p803_p10, %p799_p7 }
  0x27   : > { %807 = shalt.err (!%p804_p9)
}
  0x28   : > { %742 = dma.hbm_to_vmem [thread:$0]  (!%p1033_p13), %s233_s18, 128, %s235_s20, %s223_s27  }
  0x29   : > { %p1058_p2 = pnand %p713_p0, %p275_p1  ;;  %s731_s19 = sshll.u32 %s923_s26, 6 }
  0x2a   : > { %s259_s29 = scalar_lea.vmem [#allocation6], %s710_s22  ;;  %s264_s14 = scalar_lea.hbm %s1180_s4, %s731_s19 }
  0x2b   : > { %s267_s30 = sshll.u32 %s259_s29, 4  ;;  %s265_s15 = sshll.u32 %s264_s14, 4  ;;  %s268_s30 = int_to_ptr.vmem [resolvable:$true] %s267_s30  ;;  %s266_s15 = int_to_ptr.hbm [resolvable:$true] %s265_s15 }
  0x2c   : > { %s256_s16 = scalar_lea.sflag [#allocation7], %s1024_s12  ;;  %s823_s1 = sshra.s32 %s266_s15, 4  ;;  %s824_s1 = int_to_ptr.hbm [resolvable:$true] %s823_s1 }
  0x2d   : > { %s825_s18 = scalar_lea.hbm %s824_s1, 64  ;;  %s830_s22 = scalar_lea.hbm %s1180_s4, 128 }
  0x2e   : > { %p826_p9 = scmp.ne.s32.totalorder %s824_s1, %s825_s18  ;;  %p831_p4 = scmp.lt.s32.totalorder %s824_s1, %s1180_s4 }
  0x2f   : > { %p832_p7 = scmp.lt.s32.totalorder %s830_s22, %s825_s18 }
  0x30   : > { %p828_p0 = pnand %p826_p9, %p797_p3 }
  0x31   : > { %p833_p5 = por %p832_p7, %p831_p4 }
  0x32   : > { %p829_p1 = pneg %p828_p0 }
  0x34   : > { %p834_p8 = pnand %p833_p5, %p829_p1 }
  0x36   : > { %837 = shalt.err (!%p834_p8)
}
  0x37   : > { %s925_s12 = smov 128   ;;  %s926_s19 = smov 8  }
  0x38   : > { %745 = dma.hbm_to_vmem [thread:$0]  (!%p1033_p13), %s266_s15, 1024, %s268_s30, %s256_s16, %s925_s12, %s925_s12, %s926_s19  }
  0x39   : > { %279 = sbr.rel (%p1058_p2) target bundleno = 711 (0x2c7), region = 44  ;;  %s1081_s8 = sand.u32 (!%p1058_p2), 1, %s915_s24  }
  0x3a   : > { %s714_s1 = sshll.u32 (!%p1058_p2), %s1081_s8, 3  ;;  %s282_s7 = scalar_lea.sflag (!%p1058_p2), [#allocation4], %s1081_s8 }
  0x3b   : > { %s285_s13 = scalar_lea.vmem (!%p1058_p2), [#allocation3], %s714_s1 }
  0x3e   : > { %898 = dma.done.wait (%p1008_p6), %s282_s7, 128  }
  0x3f   : > { %900 = vsyncadd (%p1008_p6), %s282_s7, 4294967168  ;;  %s715_s21 = sshll.u32 %s1081_s8, 6  ;;  %s292_s17 = scalar_lea.sflag [#allocation7], %s1081_s8 }
  0x40   : > { %s1093_s30 = scalar_lea.vmem [#allocation6], %s715_s21 }
  0x41   : > { %902 = dma.done.wait (%p1008_p6), %s292_s17, 1024  }
  0x42   : > { %904 = vsyncadd (%p1008_p6), %s292_s17, 4294966272  ;;  %p338_p13 = scmp.lt.s32.totalorder %s986_s0, 1  ;;  %vm404_vm0 = vcmask 258048   ;;  %v351_v3 = vld [vmem:[%s285_s13] sm:$0xff]  ;;  %vm353_vm1 = vcmask 261120   ;;  %v350_v16 = vld [vmem:[%s1181_s5 + $0x18] sm:$0xff] }
  0x43   : > { %v352_v4 = vmul.f32 %v351_v3, %v351_v3  ;;  %v349_v17 = vld [vmem:[%s1181_s5 + $0x10] sm:$0xff]  ;;  %386 = vmatpush.msra.mxu0 %v350_v16  ;;  %v348_v18 = vld [vmem:[%s1181_s5 + $0x8] sm:$0xff]  ;;  %v347_v19 = vld [vmem:[%s1181_s5] sm:$0xff]  ;;  %s346_s21 = sld [smem:[#allocation2]]  ;;  %vm466_vm8 = vcmask 1044480   ;;  %vm453_vm9 = vcmask 39936  }
  0x44   : > { %s1101_s14 = scalar_select %p338_p13, %s986_s0, 1  ;;  %v401_v33 = vld [vmem:[%s1093_s30 + $0x38] sm:$0xff]  ;;  %v400_v34 = vld [vmem:[%s1093_s30 + $0x30] sm:$0xff]  ;;  %v399_v35 = vld [vmem:[%s1093_s30 + $0x28] sm:$0xff]  ;;  %vm547_vm10 = vcmask 523264  }
  0x45   : > { %v354_v5 = vsel %vm353_vm1, %v352_v4, 0.0  ;;  %387 = vmatpush.msra.mxu0 %v349_v17  ;;  %559 = vmatpush.msra.mxu3 %v401_v33  ;;  %v398_v36 = vld [vmem:[%s1093_s30 + $0x20] sm:$0xff]  ;;  %v397_v37 = vld [vmem:[%s1093_s30 + $0x18] sm:$0xff]  ;;  %v396_v42 = vld [vmem:[%s1093_s30 + $0x10] sm:$0xff]  ;;  %s337_s9 = scalar_lea.vmem [#allocation8], %s714_s1  ;;  %s573_s29 = scalar_lea.sflag [#allocation5], %s1081_s8 }
  0x46   : > { %s717_s15 = sshll.u32 %s1101_s14, 3  ;;  %v395_v43 = vld [vmem:[%s1093_s30 + $0x8] sm:$0xff]  ;;  %v394_v44 = vld [vmem:[%s1093_s30] sm:$0xff]  ;;  %s728_s30 = sshll.u32 %s986_s0, 3 }
  0x47   : > { %s341_s20 = scalar_lea.vmem %s1178_s2, %s717_s15  ;;  %388 = vmatpush.msra.mxu0 %v348_v18  ;;  %s345_s18 = scalar_lea.vmem %s1179_s3, %s717_s15  ;;  %560 = vmatpush.msra.mxu3 %v400_v34 }
  0x48   : > { %v402_v0 = vld [vmem:[%s341_s20] sm:$0x1f]  ;;  %s583_s20 = scalar_lea.hbm %s1182_s6, %s728_s30  ;;  %s585_s27 = sshll.u32 %s337_s9, 4  ;;  %s586_s27 = int_to_ptr.vmem [resolvable:$true] %s585_s27 }
  0x49   : > { %v403_v1 = vmul.f32 %v402_v0, %v402_v0  ;;  %389 = vmatpush.msra.mxu0 %v347_v19  ;;  %v368_v28 = vstv %s346_s21  ;;  %v420_v32 = vld [vmem:[%s345_s18] sm:$0x1f]  ;;  %561 = vmatpush.msra.mxu3 %v399_v35  ;;  %s587_s22 = sshll.u32 %s583_s20, 4  ;;  %s873_s1 = scalar_lea.hbm %s1182_s6, 16  ;;  %s588_s22 = int_to_ptr.hbm [resolvable:$true] %s587_s22 }
  0x4a   : > { %732 = vmatpush.msk.msra.mxu1 %vm466_vm8, %v420_v32  ;;  %s867_s12 = sshra.s32 %s588_s22, 4  ;;  %s868_s12 = int_to_ptr.hbm [resolvable:$true] %s867_s12 }
  0x4b   : > { %v405_v2 = vsel %vm404_vm0, %v403_v1, 0.0  ;;  %720 = vmatpush.msk.msrb.mxu0 %vm466_vm8, %v420_v32  ;;  %562 = vmatpush.msra.mxu3 %v398_v36  ;;  %s869_s19 = scalar_lea.hbm %s868_s12, 8  ;;  %p874_p2 = scmp.lt.s32.totalorder %s868_s12, %s1182_s6 }
  0x4c   : > { %406 = vadd.xlane.f32.xlu0 %v405_v2  ;;  %p870_p6 = scmp.ne.s32.totalorder %s868_s12, %s869_s19  ;;  %p875_p9 = scmp.lt.s32.totalorder %s873_s1, %s869_s19 }
  0x4d   : > { %563 = vmatpush.msra.mxu3 %v397_v37 }
  0x4e   : > { %p871_p3 = pnand %p870_p6, %p1015_p11  ;;  %p876_p0 = por %p875_p9, %p874_p2 }
  0x4f   : > { %564 = vmatpush.msra.mxu3 %v396_v42 }
  0x50   : > { %p872_p10 = pneg %p871_p3 }
  0x51   : > { %565 = vmatpush.msra.mxu3 %v395_v43 }
  0x52   : > { %p877_p1 = pnand %p876_p0, %p872_p10 }
  0x53   : > { %566 = vmatpush.msra.mxu3 %v394_v44 }
  0x54   : > { %355 = vadd.xlane.f32.xlu0 %v354_v5 }
  0xbf   : > { %v407_v6 = vpop.xlane.xlu0 %406 }
  0xc0   : > { %v408_v7 = vmax.f32 %v407_v6, 1e-24 }
  0xc2   : > { %787 = vrsqrt.f32 %v408_v7  ;;  %vm415_vm3 = vweird.f32 %v408_v7 }
  0xc7   : > { %v356_v20 = vpop.xlane.xlu0 %355 }
  0xc8   : > { %v788_v8 = vpop.eup %787  ;;  %v357_v21 = vmax.f32 %v356_v20, 1e-24 }
  0xc9   : > { %v410_v9 = vmul.f32 %v788_v8, %v408_v7  ;;  %vm416_vm2 = vweird.f32 %v788_v8 }
  0xca   : > { %vm417_vm4 = vmor %vm415_vm3, %vm416_vm2  ;;  %789 = vrsqrt.f32 %v357_v21  ;;  %vm364_vm5 = vweird.f32 %v357_v21 }
  0xcb   : > { %v411_v10 = vmul.f32 %v788_v8, %v410_v9 }
  0xcd   : > { %v412_v11 = vmul.f32 0.5, %v411_v10 }
  0xcf   : > { %v413_v12 = vsub.f32 1.5, %v412_v11 }
  0xd0   : > { %v790_v22 = vpop.eup %789 }
  0xd1   : > { %v414_v13 = vmul.f32 %v788_v8, %v413_v12  ;;  %v359_v23 = vmul.f32 %v790_v22, %v357_v21  ;;  %vm365_vm6 = vweird.f32 %v790_v22 }
  0xd2   : > { %vm366_vm7 = vmor %vm364_vm5, %vm365_vm6 }
  0xd3   : > { %v418_v14 = vsel %vm417_vm4, %v788_v8, %v414_v13  ;;  %v360_v24 = vmul.f32 %v790_v22, %v359_v23 }
  0xd4   : > { %v419_v15 = vmul.f32 %v418_v14, %v402_v0 }
  0xd5   : > { %v361_v25 = vmul.f32 0.5, %v360_v24 }
  0xd6   : > { %421 = vxpose.xlu1.b32.start.end [1/1] (short) (narrow) %v419_v15, 32 }
  0xd7   : > { %v362_v26 = vsub.f32 1.5, %v361_v25 }
  0xd9   : > { %v363_v27 = vmul.f32 %v790_v22, %v362_v26 }
  0xdb   : > { %v367_v29 = vsel %vm366_vm7, %v790_v22, %v363_v27 }
  0xdc   : > { %v369_v30 = vmul.f32 %v368_v28, %v367_v29 }
  0xde   : > { %v1122_v31 = vmul.f32 %v369_v30, %v351_v3 }
  0xe0   : > { %719 = vmatmul.msk.f32.vlgmr.msra.gmra.mxu0 %vm353_vm1, %v1122_v31 }
 0x15d   : > { %v391_v45 = vpop.f32.mrf.mxu0 }
 0x15e   : > { %726 = vmatmul.msk.f32.vlgmr.msra.gmra.mxu3 %vm547_vm10, %v391_v45 }
 0x17a   : > { %v437_v38 = vpop.trf.xlu1 }
 0x17b   : > { %721 = vmatmul.msk.f32.vlgmr.msrb.gmra.mxu0 %vm453_vm9, %v437_v38 }
 0x182   : > { %v438_v39 = vpop.trf.xlu1 }
 0x183   : > { %722 = vmatmul.msk.f32.vlgmr.msra.gmra.mxu1 %vm453_vm9, %v438_v39 }
 0x18a   : > { %v439_v40 = vpop.trf.xlu1 }
 0x18b   : > { %723 = vmatmul.msk.f32.gmra.mxu1 %vm453_vm9, %v439_v40 }
 0x192   : > { %v440_v41 = vpop.trf.xlu1 }
 0x193   : > { %724 = vmatmul.msk.f32.gmra.mxu1 %vm453_vm9, %v440_v41 }
 0x1e1   : > { %v568_v11 = vpop.f32.mrf.mxu3 }
 0x1f8   : > { %v487_v48 = vpop.f32.mrf.mxu0 }
 0x1f9   : > { %v499_v50 = vmul.f32 %v487_v48, %v487_v48 }
 0x200   : > { %v490_v46 = vpop.f32.mrf.mxu1 }
 0x201   : > { %v500_v49 = vmul.f32 %v490_v46, %v490_v46 }
 0x203   : > { %v503_v52 = vadd.f32 %v500_v49, %v499_v50 }
 0x208   : > { %v493_v47 = vpop.f32.mrf.mxu1 }
 0x209   : > { %v501_v51 = vmul.f32 %v493_v47, %v493_v47 }
 0x20b   : > { %v504_v54 = vadd.f32 %v503_v52, %v501_v51 }
 0x210   : > { %v496_v53 = vpop.f32.mrf.mxu1 }
 0x211   : > { %v502_v55 = vmul.f32 %v496_v53, %v496_v53 }
 0x213   : > { %v505_v56 = vadd.f32 %v504_v54, %v502_v55 }
 0x215   : > { %v506_v57 = vrot.slane %v505_v56, 4 }
 0x217   : > { %v507_v58 = vadd.f32 %v506_v57, %v505_v56 }
 0x219   : > { %v508_v59 = vrot.slane %v507_v58, 2 }
 0x21b   : > { %v509_v60 = vadd.f32 %v508_v59, %v507_v58 }
 0x21d   : > { %v510_v61 = vrot.slane %v509_v60, 1 }
 0x21f   : > { %v511_v62 = vadd.f32 %v510_v61, %v509_v60 }
 0x221   : > { %v512_v63 = vmax.f32 %v511_v62, 1e-24 }
 0x223   : > { %791 = vrsqrt.f32 %v512_v63  ;;  %vm519_vm12 = vweird.f32 %v512_v63 }
 0x229   : > { %v792_v0 = vpop.eup %791 }
 0x22a   : > { %v514_v1 = vmul.f32 %v792_v0, %v512_v63  ;;  %vm520_vm11 = vweird.f32 %v792_v0 }
 0x22b   : > { %vm521_vm13 = vmor %vm519_vm12, %vm520_vm11 }
 0x22c   : > { %v515_v2 = vmul.f32 %v792_v0, %v514_v1 }
 0x22e   : > { %v516_v3 = vmul.f32 0.5, %v515_v2 }
 0x230   : > { %v517_v4 = vsub.f32 1.5, %v516_v3 }
 0x232   : > { %v518_v5 = vmul.f32 %v792_v0, %v517_v4 }
 0x234   : > { %v522_v6 = vsel %vm521_vm13, %v792_v0, %v518_v5 }
 0x235   : > { %v526_v7 = vmul.f32 %v522_v6, %v496_v53  ;;  %v525_v8 = vmul.f32 %v522_v6, %v493_v47  ;;  %v524_v9 = vmul.f32 %v522_v6, %v490_v46  ;;  %v523_v10 = vmul.f32 %v522_v6, %v487_v48 }
 0x237   : > { %539 = vmatpush.msra.mxu2 %v526_v7 }
 0x239   : > { %540 = vmatpush.msra.mxu2 %v525_v8 }
 0x23b   : > { %541 = vmatpush.msra.mxu2 %v524_v9 }
 0x23d   : > { %542 = vmatpush.msra.mxu2 %v523_v10 }
 0x23e   : > { %725 = vmatmul.msk.f32.vlgmr.msra.gmra.mxu2 %vm353_vm1, %v1122_v31 }
 0x2c1   : > { %v544_v12 = vpop.f32.mrf.mxu2 }
 0x2c2   : > { %v569_v13 = vadd.f32 %v568_v11, %v544_v12 }
 0x2c4   : > { %571 = vst [vmem:[%s337_s9] sm:$0xff] %v569_v13 }
 0x2c5   : > { %880 = shalt.err (!%p877_p1)
}
 0x2c6   : > { %737 = dma.vmem_to_hbm [thread:$0]  (%p1015_p11), %s586_s27, 128, %s588_s22, %s573_s29  }
 0x2c7 PF: > { %s599_s8 = sand.u32 1, %s911_s23   ;;  %p1192_p4 = scmp.ge.s32.totalorder %s923_s26, 2 }
 0x2c8   : > { %s600_s17 = scalar_lea.sflag [#allocation5], %s599_s8 }
 0x2c9   : > { %p747_p7 = pnand %p1192_p4, %p1019_p12 }
 0x2cb   : > { %p748_p5 = pneg %p747_p7 }
 0x2cd   : > { %906 = dma.done.wait (%p748_p5), %s600_s17, 128  }
 0x2ce   : > { %908 = vsyncadd (%p748_p5), %s600_s17, 4294967168  ;;  %s1193_s16 = sld [smem:[#allocation12_spill]]  ;;  %p23_p8 = scmp.ge.s32.totalorder %s990_s28, 4  }
 0x2cf   : > { %s1194_s23 = smov %s915_s24  ;;  %s1195_s24 = smov %s919_s25 }
 0x2d0   : > { %s1197_s26 = smov %s990_s28  ;;  %25 = sbr.rel (!%p23_p8) target bundleno = 10 (0xa), region = 108 }
 0x2d4   : > { %s1196_s25 = smov %s1193_s16 }
 0x2d5   :  { %606 = vsyncpa [#allocation4], 1 }
 0x2d6   :  { %608 = vsyncpa [#allocation4 + $0x1], 1 }
 0x2d7   :  { %609 = vsyncpa [#allocation7], 1 }
 0x2d8   :  { %611 = vsyncpa [#allocation7 + $0x1], 1 }
 0x2d9   :  { %612 = vsyncpa [#allocation5], 1 }
 0x2da   :  { %614 = vsyncpa [#allocation5 + $0x1], 1 }

</bundles_post_ra>
